<compile_context>
chip_gen: v6e
topology: v6e:2x2x1
jax: 0.10.0
libtpu: 0.0.40
codegen_flags: <defaults>
</compile_context>

<pallas_src>
import functools
import math

import jax
import jax.numpy as jnp
import numpy as np
from jax.experimental import pallas as pl
from jax.experimental.pallas import tpu as pltpu

BN_EPS = 1e-5
H1 = 128                      # shared hidden width
H2 = 64                       # per-branch hidden width
NUM_BRANCHES = 3
H2CAT = NUM_BRANCHES * H2     # 192: fused branch hidden width
DEFAULT_TILE_B = 2048         # rows per grid step (amortizes per-step overhead on v5e/v6e)
VMEM_TILE_BUDGET = 20 * 1024 * 1024   # per-step working-set budget (fits v7x scoped VMEM)


def _round_up(n, m):
    return ((n + m - 1) // m) * m


def _gelu(x, approximate):
    if approximate:
        # tanh-form GELU: tanh goes to the EUP (its own VLIW slot), freeing the VALU.
        return jax.nn.gelu(x, approximate=True)
    # PyTorch nn.GELU() default: exact erf formulation (VPU polynomial).
    return 0.5 * x * (1.0 + jax.lax.erf(x * (1.0 / math.sqrt(2.0))))


def _choose_tile_b(B, D, requested):
    """Pick a lane-aligned batch tile that fits VMEM and keeps >=2 grid steps when possible."""
    b_pad128 = _round_up(B, 128)
    tile = min(_round_up(requested, 128), b_pad128)
    # Per-row bytes per pipelined step.  Narrow D still occupies full 128-lane vregs, so pad.
    d_lanes = _round_up(D, 128)
    row_bytes = (2 * d_lanes * 2            # x tile, bf16, double-buffered
                 + 4 * (H1 + H2CAT) * 2     # f32 h / z temporaries (+headroom)
                 + 2 * 4 * 2)               # attack-type / output rows
    while tile > 128 and tile * row_bytes > VMEM_TILE_BUDGET:
        tile = _round_up(tile // 2, 128)
    # v7x megacore: ensure >= 2 grid steps so both TensorCores get work.
    if tile >= b_pad128 and b_pad128 >= 256:
        tile = _round_up(b_pad128 // 2, 128)
    return tile


def _attack_value_kernel(x_ref, at_ref, w1_ref, b1_ref, w2_ref, b2_ref,
                         w3_ref, b3_ref, out_ref, *, approx_gelu):
    # shared: (eval BatchNorm folded into Linear) -> GELU   (Dropout = identity in eval)
    # bf16 operands on the MXU, f32 accumulation; all adds/activations in f32.
    h = _gelu(
        jnp.dot(x_ref[...], w1_ref[...], preferred_element_type=jnp.float32) + b1_ref[...],
        approx_gelu,
    )                                                                 # (TB, 128) f32

    # fused branch heads: one wide bf16 matmul + one GELU pass
    z = _gelu(
        jnp.dot(h.astype(jnp.bfloat16), w2_ref[...],
                preferred_element_type=jnp.float32) + b2_ref[...],
        approx_gelu,
    )                                                                 # (TB, 192) f32

    # all three head values at once, batch on the lane axis (tiny matmul, kept f32):
    #   v[i, b] = sum_k w3blk[i, k] * z[b, k] + b3[i]
    v = jax.lax.dot_general(
        w3_ref[...], z,
        dimension_numbers=(((1,), (1,)), ((), ())),
        preferred_element_type=jnp.float32,
    ) + b3_ref[...]                                                   # (3, TB)

    # per-row branch select; rows whose type is not in {1,2,3} stay exactly 0
    at = at_ref[...]                                                  # (1, TB) int32
    branch_ids = jax.lax.broadcasted_iota(jnp.int32, v.shape, 0) + 1  # rows = 1,2,3
    sel = branch_ids == at                                            # (3, TB) one-hot
    out_ref[...] = jnp.sum(jnp.where(sel, v, 0.0), axis=0, keepdims=True)  # (1, TB)


def attack_value_predictor(x, attack_types, params, *, tile_b=None, approx_gelu=True):
    """x: (B, D) f32, attack_types: (B,) int. Returns (B,) f32."""
    B, D = x.shape
    tile_b = _choose_tile_b(B, D, DEFAULT_TILE_B if tile_b is None else tile_b)
    b_pad = _round_up(B, tile_b)
    num_tiles = b_pad // tile_b

    # ---- parameter prep (tiny, done once outside the kernel) ----------------
    # Fold eval-mode BatchNorm into the first Linear.
    s = params["gamma"] * jax.lax.rsqrt(params["run_var"] + BN_EPS)              # (1, 128)
    w1f = (params["w1"] * s).astype(jnp.bfloat16)                                # (D, 128)
    b1f = ((params["b1"] - params["run_mean"]) * s + params["beta"]).astype(jnp.float32)
    # Fuse the three (128,64) branch Linears into one (128,192) matmul ...
    w2cat = params["w2"].transpose(1, 0, 2).reshape(H1, H2CAT).astype(jnp.bfloat16)
    b2cat = params["b2"].reshape(1, H2CAT).astype(jnp.float32)                   # (1, 192)
    # ... and the three (64,1) heads into a block-diagonal (3,192) matrix (kept f32).
    w3rows = params["w3"][:, :, 0]                                               # (3, 64)
    eye = jnp.eye(NUM_BRANCHES, dtype=w3rows.dtype)
    w3blk = (eye[:, :, None] * w3rows[None, :, :]).reshape(NUM_BRANCHES, H2CAT)
    w3blk = w3blk.astype(jnp.float32)
    b3col = params["b3"].reshape(NUM_BRANCHES, 1).astype(jnp.float32)            # (3, 1)

    # ---- lane-dense batch I/O ------------------------------------------------
    x_p = x.astype(jnp.bfloat16)
    at_p = attack_types.astype(jnp.int32)
    if b_pad != B:
        x_p = jnp.pad(x_p, ((0, b_pad - B), (0, 0)))
        at_p = jnp.pad(at_p, (0, b_pad - B))          # padded rows: type 0 -> output 0
    at_row = at_p.reshape(1, b_pad)

    cost = pl.CostEstimate(
        flops=2 * b_pad * (D * H1 + H1 * H2CAT + NUM_BRANCHES * H2CAT),
        transcendentals=b_pad * (H1 + H2CAT),
        bytes_accessed=(2 * b_pad * D + 4 * b_pad + 4 * b_pad
                        + 2 * (D * H1 + H1 * H2CAT)
                        + 4 * (H1 + H2CAT + NUM_BRANCHES * H2CAT + NUM_BRANCHES)),
    )

    kernel = functools.partial(_attack_value_kernel, approx_gelu=approx_gelu)
    const2 = lambda i: (0, 0)
    out_row = pl.pallas_call(
        kernel,
        out_shape=jax.ShapeDtypeStruct((1, b_pad), jnp.float32),
        grid=(num_tiles,),
        in_specs=[
            pl.BlockSpec((tile_b, D), lambda i: (i, 0)),     # x tile (bf16)
            pl.BlockSpec((1, tile_b), lambda i: (0, i)),     # attack types (lane-dense)
            pl.BlockSpec((D, H1), const2),                   # folded W1     (resident)
            pl.BlockSpec((1, H1), const2),                   # folded b1     (resident)
            pl.BlockSpec((H1, H2CAT), const2),               # fused W2      (resident)
            pl.BlockSpec((1, H2CAT), const2),                # fused b2      (resident)
            pl.BlockSpec((NUM_BRANCHES, H2CAT), const2),     # block-diag W3 (resident)
            pl.BlockSpec((NUM_BRANCHES, 1), const2),         # b3 column     (resident)
        ],
        out_specs=pl.BlockSpec((1, tile_b), lambda i: (0, i)),
        compiler_params=pltpu.CompilerParams(
            dimension_semantics=("parallel",),
            vmem_limit_bytes=32 * 1024 * 1024,
        ),
        cost_estimate=cost,
    )(x_p, at_row, w1f, b1f, w2cat, b2cat, w3blk, b3col)

    return out_row[0, :B]    # matches outputs.squeeze()


def make_params(input_dim, key):
    ks = jax.random.split(key, 12)
    scale1 = 1.0 / math.sqrt(input_dim)
    scale2 = 1.0 / math.sqrt(H1)
    scale3 = 1.0 / math.sqrt(H2)
    return {
        "w1": jax.random.uniform(ks[0], (input_dim, H1), jnp.float32, -scale1, scale1),
        "b1": jax.random.uniform(ks[1], (1, H1), jnp.float32, -scale1, scale1),
        "gamma": 1.0 + 0.1 * jax.random.normal(ks[2], (1, H1), jnp.float32),
        "beta": 0.1 * jax.random.normal(ks[3], (1, H1), jnp.float32),
        "run_mean": 0.1 * jax.random.normal(ks[4], (1, H1), jnp.float32),
        "run_var": 1.0 + 0.1 * jax.random.uniform(ks[5], (1, H1), jnp.float32),
        "w2": jax.random.uniform(ks[6], (NUM_BRANCHES, H1, H2), jnp.float32, -scale2, scale2),
        "b2": jax.random.uniform(ks[7], (NUM_BRANCHES, 1, H2), jnp.float32, -scale2, scale2),
        "w3": jax.random.uniform(ks[8], (NUM_BRANCHES, H2, 1), jnp.float32, -scale3, scale3),
        "b3": jax.random.uniform(ks[9], (NUM_BRANCHES,), jnp.float32, -scale3, scale3),
    }


def reference_forward(x, attack_types, params, *, approximate_gelu=False):
    """Pure-JAX f32 reference of the PyTorch forward (eval mode), unfused/unfolded."""
    h = x @ params["w1"] + params["b1"]
    h = (h - params["run_mean"]) / jnp.sqrt(params["run_var"] + BN_EPS) * params["gamma"] \
        + params["beta"]
    h = _gelu(h, approximate_gelu)
    out = jnp.zeros((x.shape[0],), jnp.float32)
    for i in range(NUM_BRANCHES):
        z = _gelu(h @ params["w2"][i] + params["b2"][i], approximate_gelu)
        v = (z @ params["w3"][i])[:, 0] + params["b3"][i]
        out = jnp.where(attack_types == (i + 1), v, out)
    return out


if __name__ == "__main__":
    key = jax.random.PRNGKey(0)
    k_x, k_at, k_p = jax.random.split(key, 3)

    B, D = 8, 32
    x = jax.random.normal(k_x, (B, D), jnp.float32)
    # include type-0 / type-4 rows so the "no matching branch -> stays 0" path is exercised
    attack_types = jax.random.randint(k_at, (B,), 0, 5, dtype=jnp.int32)
    params = make_params(D, k_p)

    out = attack_value_predictor(x, attack_types, params)
    out = jax.block_until_ready(out)

    # Same activation as the kernel (tanh GELU), f32 math: isolates bf16 matmul error.
    ref_tanh = reference_forward(x, attack_types, params, approximate_gelu=True)
    np.testing.assert_allclose(np.asarray(out), np.asarray(ref_tanh), rtol=2e-2, atol=2e-2)
    # Against the exact-erf PyTorch semantics (loose: bf16 + tanh-GELU approximation).
    ref_exact = reference_forward(x, attack_types, params, approximate_gelu=False)
    np.testing.assert_allclose(np.asarray(out), np.asarray(ref_exact), rtol=5e-2, atol=5e-2)

    print("KERNEL_OK")
</pallas_src>

<mosaic_0001>
module attributes {stable_mosaic.version = 11 : i64} {
  func.func @_attack_value_kernel(%arg0: i32, %arg1: memref<128x32xbf16, #tpu.memory_space<vmem>>, %arg2: memref<1x128xi32, #tpu.memory_space<vmem>>, %arg3: memref<32x128xbf16, #tpu.memory_space<vmem>>, %arg4: memref<1x128xf32, #tpu.memory_space<vmem>>, %arg5: memref<128x192xbf16, #tpu.memory_space<vmem>>, %arg6: memref<1x192xf32, #tpu.memory_space<vmem>>, %arg7: memref<3x192xf32, #tpu.memory_space<vmem>>, %arg8: memref<3x1xf32, #tpu.memory_space<vmem>>, %arg9: memref<1x128xf32, #tpu.memory_space<vmem>>) attributes {dimension_semantics = [#tpu.dimension_semantics<parallel>], iteration_bounds = array<i64: 1>, scalar_prefetch = 0 : i64, scratch_operands = 0 : i64, tpu.core_type = #tpu.core_type<tc>, window_params = [{transform_indices = @transform_0, window_bounds = array<i64: 128, 32>}, {transform_indices = @transform_1, window_bounds = array<i64: 1, 128>}, {pipeline_mode = #tpu.pipeline_mode<synchronous>, transform_indices = @transform_2, window_bounds = array<i64: 32, 128>}, {pipeline_mode = #tpu.pipeline_mode<synchronous>, transform_indices = @transform_3, window_bounds = array<i64: 1, 128>}, {pipeline_mode = #tpu.pipeline_mode<synchronous>, transform_indices = @transform_4, window_bounds = array<i64: 128, 192>}, {pipeline_mode = #tpu.pipeline_mode<synchronous>, transform_indices = @transform_5, window_bounds = array<i64: 1, 192>}, {pipeline_mode = #tpu.pipeline_mode<synchronous>, transform_indices = @transform_6, window_bounds = array<i64: 3, 192>}, {pipeline_mode = #tpu.pipeline_mode<synchronous>, transform_indices = @transform_7, window_bounds = array<i64: 3, 1>}, {transform_indices = @transform_8, window_bounds = array<i64: 1, 128>}]} {
    %c0 = arith.constant 0 : index
    %c0_0 = arith.constant 0 : index
    %0 = vector.load %arg1[%c0, %c0_0] : memref<128x32xbf16, #tpu.memory_space<vmem>>, vector<128x32xbf16>
    %c0_1 = arith.constant 0 : index
    %c0_2 = arith.constant 0 : index
    %1 = vector.load %arg3[%c0_1, %c0_2] : memref<32x128xbf16, #tpu.memory_space<vmem>>, vector<32x128xbf16>
    %cst = arith.constant dense<0.000000e+00> : vector<128x128xf32>
    %2 = tpu.matmul %0, %1, %cst {dimension_numbers = #tpu.dot_dimension_numbers<[1], [0], [0], [1], [0, 0, 1, 1], [], []>} : vector<128x32xbf16>, vector<32x128xbf16>, vector<128x128xf32> -> vector<128x128xf32>
    %c0_3 = arith.constant 0 : index
    %c0_4 = arith.constant 0 : index
    %3 = vector.load %arg4[%c0_3, %c0_4] : memref<1x128xf32, #tpu.memory_space<vmem>>, vector<1x128xf32>
    %4 = vector.broadcast %3 : vector<1x128xf32> to vector<128x128xf32>
    %5 = arith.addf %2, %4 : vector<128x128xf32>
    %6 = arith.mulf %5, %5 : vector<128x128xf32>
    %7 = arith.mulf %5, %6 : vector<128x128xf32>
    %cst_5 = arith.constant 4.471500e-02 : f32
    %8 = vector.broadcast %cst_5 : f32 to vector<128x128xf32>
    %9 = arith.mulf %8, %7 : vector<128x128xf32>
    %10 = arith.addf %5, %9 : vector<128x128xf32>
    %cst_6 = arith.constant 0.797884583 : f32
    %11 = vector.broadcast %cst_6 : f32 to vector<128x128xf32>
    %12 = arith.mulf %11, %10 : vector<128x128xf32>
    %13 = math.tanh %12 : vector<128x128xf32>
    %cst_7 = arith.constant 1.000000e+00 : f32
    %14 = vector.broadcast %cst_7 : f32 to vector<128x128xf32>
    %15 = arith.addf %14, %13 : vector<128x128xf32>
    %cst_8 = arith.constant 5.000000e-01 : f32
    %16 = vector.broadcast %cst_8 : f32 to vector<128x128xf32>
    %17 = arith.mulf %16, %15 : vector<128x128xf32>
    %18 = arith.mulf %5, %17 : vector<128x128xf32>
    %19 = arith.truncf %18 : vector<128x128xf32> to vector<128x128xbf16>
    %c0_9 = arith.constant 0 : index
    %c0_10 = arith.constant 0 : index
    %20 = vector.load %arg5[%c0_9, %c0_10] : memref<128x192xbf16, #tpu.memory_space<vmem>>, vector<128x192xbf16>
    %cst_11 = arith.constant dense<0.000000e+00> : vector<128x192xf32>
    %21 = tpu.matmul %19, %20, %cst_11 {dimension_numbers = #tpu.dot_dimension_numbers<[1], [0], [0], [1], [0, 0, 1, 1], [], []>} : vector<128x128xbf16>, vector<128x192xbf16>, vector<128x192xf32> -> vector<128x192xf32>
    %c0_12 = arith.constant 0 : index
    %c0_13 = arith.constant 0 : index
    %22 = vector.load %arg6[%c0_12, %c0_13] : memref<1x192xf32, #tpu.memory_space<vmem>>, vector<1x192xf32>
    %23 = vector.broadcast %22 : vector<1x192xf32> to vector<128x192xf32>
    %24 = arith.addf %21, %23 : vector<128x192xf32>
    %25 = arith.mulf %24, %24 : vector<128x192xf32>
    %26 = arith.mulf %24, %25 : vector<128x192xf32>
    %cst_14 = arith.constant 4.471500e-02 : f32
    %27 = vector.broadcast %cst_14 : f32 to vector<128x192xf32>
    %28 = arith.mulf %27, %26 : vector<128x192xf32>
    %29 = arith.addf %24, %28 : vector<128x192xf32>
    %cst_15 = arith.constant 0.797884583 : f32
    %30 = vector.broadcast %cst_15 : f32 to vector<128x192xf32>
    %31 = arith.mulf %30, %29 : vector<128x192xf32>
    %32 = math.tanh %31 : vector<128x192xf32>
    %cst_16 = arith.constant 1.000000e+00 : f32
    %33 = vector.broadcast %cst_16 : f32 to vector<128x192xf32>
    %34 = arith.addf %33, %32 : vector<128x192xf32>
    %cst_17 = arith.constant 5.000000e-01 : f32
    %35 = vector.broadcast %cst_17 : f32 to vector<128x192xf32>
    %36 = arith.mulf %35, %34 : vector<128x192xf32>
    %37 = arith.mulf %24, %36 : vector<128x192xf32>
    %c0_18 = arith.constant 0 : index
    %c0_19 = arith.constant 0 : index
    %38 = vector.load %arg7[%c0_18, %c0_19] : memref<3x192xf32, #tpu.memory_space<vmem>>, vector<3x192xf32>
    %cst_20 = arith.constant dense<0.000000e+00> : vector<3x128xf32>
    %39 = tpu.matmul %38, %37, %cst_20 {dimension_numbers = #tpu.dot_dimension_numbers<[1], [1], [0], [0], [0, 0, 1, 0], [], []>} : vector<3x192xf32>, vector<128x192xf32>, vector<3x128xf32> -> vector<3x128xf32>
    %c0_21 = arith.constant 0 : index
    %c0_22 = arith.constant 0 : index
    %40 = vector.load %arg8[%c0_21, %c0_22] : memref<3x1xf32, #tpu.memory_space<vmem>>, vector<3x1xf32>
    %41 = vector.broadcast %40 : vector<3x1xf32> to vector<3x128xf32>
    %42 = arith.addf %39, %41 : vector<3x128xf32>
    %c0_23 = arith.constant 0 : index
    %c0_24 = arith.constant 0 : index
    %43 = vector.load %arg2[%c0_23, %c0_24] : memref<1x128xi32, #tpu.memory_space<vmem>>, vector<1x128xi32>
    %44 = tpu.iota {dimensions = array<i32: 0>} : vector<3x128xi32>
    %c1_i32 = arith.constant 1 : i32
    %45 = vector.broadcast %c1_i32 : i32 to vector<3x128xi32>
    %46 = arith.addi %44, %45 : vector<3x128xi32>
    %47 = vector.broadcast %43 : vector<1x128xi32> to vector<3x128xi32>
    %48 = arith.cmpi eq, %46, %47 : vector<3x128xi32>
    %cst_25 = arith.constant 0.000000e+00 : f32
    %49 = vector.broadcast %cst_25 : f32 to vector<3x128xf32>
    %50 = arith.select %48, %42, %49 : vector<3x128xi1>, vector<3x128xf32>
    %cst_26 = arith.constant dense<0.000000e+00> : vector<128xf32>
    %51 = vector.multi_reduction <add>, %50, %cst_26 [0] : vector<3x128xf32> to vector<128xf32>
    %52 = vector.shape_cast %51 : vector<128xf32> to vector<1x128xf32>
    %c0_27 = arith.constant 0 : index
    %c0_28 = arith.constant 0 : index
    %53 = vector.load %arg9[%c0_27, %c0_28] : memref<1x128xf32, #tpu.memory_space<vmem>>, vector<1x128xf32>
    tpu.vector_store %arg9[%c0_27, %c0_28], %52 {strides = array<i32>} : memref<1x128xf32, #tpu.memory_space<vmem>>, vector<1x128xf32>,
    return
  }
  func.func @transform_0(%arg0: i32) -> (i32, i32) {
    %c0_i32 = arith.constant 0 : i32
    %c0_i32_0 = arith.constant 0 : i32
    return %arg0, %c0_i32 : i32, i32
  }
  func.func @transform_1(%arg0: i32) -> (i32, i32) {
    %c0_i32 = arith.constant 0 : i32
    %c0_i32_0 = arith.constant 0 : i32
    return %c0_i32, %arg0 : i32, i32
  }
  func.func @transform_2(%arg0: i32) -> (i32, i32) {
    %c0_i32 = arith.constant 0 : i32
    %c0_i32_0 = arith.constant 0 : i32
    %c0_i32_1 = arith.constant 0 : i32
    return %c0_i32, %c0_i32_0 : i32, i32
  }
  func.func @transform_3(%arg0: i32) -> (i32, i32) {
    %c0_i32 = arith.constant 0 : i32
    %c0_i32_0 = arith.constant 0 : i32
    %c0_i32_1 = arith.constant 0 : i32
    return %c0_i32, %c0_i32_0 : i32, i32
  }
  func.func @transform_4(%arg0: i32) -> (i32, i32) {
    %c0_i32 = arith.constant 0 : i32
    %c0_i32_0 = arith.constant 0 : i32
    %c0_i32_1 = arith.constant 0 : i32
    return %c0_i32, %c0_i32_0 : i32, i32
  }
  func.func @transform_5(%arg0: i32) -> (i32, i32) {
    %c0_i32 = arith.constant 0 : i32
    %c0_i32_0 = arith.constant 0 : i32
    %c0_i32_1 = arith.constant 0 : i32
    return %c0_i32, %c0_i32_0 : i32, i32
  }
  func.func @transform_6(%arg0: i32) -> (i32, i32) {
    %c0_i32 = arith.constant 0 : i32
    %c0_i32_0 = arith.constant 0 : i32
    %c0_i32_1 = arith.constant 0 : i32
    return %c0_i32, %c0_i32_0 : i32, i32
  }
  func.func @transform_7(%arg0: i32) -> (i32, i32) {
    %c0_i32 = arith.constant 0 : i32
    %c0_i32_0 = arith.constant 0 : i32
    %c0_i32_1 = arith.constant 0 : i32
    return %c0_i32, %c0_i32_0 : i32, i32
  }
  func.func @transform_8(%arg0: i32) -> (i32, i32) {
    %c0_i32 = arith.constant 0 : i32
    %c0_i32_0 = arith.constant 0 : i32
    return %c0_i32, %arg0 : i32, i32
  }
}

</mosaic_0001>

<bundles_post_ra>
// kernel: tpu_custom_call.1
= control target key start
LH: loop header
LB: loop body
LE: loop exit
PB: predicated region body
PF: predicated region fallthrough
CT: control target
= control target key end

     0   :  { %vm110_vm0 = vcmask 261120   ;;  %s1926_s0 = inlined_call_operand.vmem [shape: bf16[128,32], index: 0, kind: input, shape index: {}]   ;;  %s1927_s1 = inlined_call_operand.vmem [shape: s32[1,128], index: 1, kind: input, shape index: {}]   ;;  %s1928_s2 = inlined_call_operand.vmem [shape: bf16[32,128], index: 2, kind: input, shape index: {}]   ;;  %s1929_s3 = inlined_call_operand.vmem [shape: f32[1,128], index: 3, kind: input, shape index: {}]   ;;  %s1930_s4 = inlined_call_operand.vmem [shape: bf16[128,192], index: 4, kind: input, shape index: {}]   ;;  %s1931_s5 = inlined_call_operand.vmem [shape: f32[1,192], index: 5, kind: input, shape index: {}]   ;;  %s1932_s6 = inlined_call_operand.vmem [shape: f32[3,192], index: 6, kind: input, shape index: {}]   ;;  %s1933_s7 = inlined_call_operand.vmem [shape: f32[3,1], index: 7, kind: input, shape index: {}]   ;;  %s1934_s8 = inlined_call_operand.hbm [shape: f32[1,128], index: 8, kind: output, shape index: {}]  }
   0x1   :  { %v1142_v0 = vld [vmem:[%s1928_s2 + $0x8] sm:$0xff]   ;;  %v1143_v1 = vld [vmem:[%s1928_s2] sm:$0xff]   ;;  %v1146_v4 = vld [vmem:[%s1926_s0 + $0x10] sm:$0xff]  }
   0x2   :  { %1119 = vmatprep.subr.bf16.mxu0 %v1142_v0  ;;  %v1144_v2 = vld [vmem:[%s1926_s0] sm:$0xff]   ;;  %v1145_v3 = vld [vmem:[%s1926_s0 + $0x8] sm:$0xff]   ;;  %v1147_v5 = vld [vmem:[%s1926_s0 + $0x18] sm:$0xff]  }
   0x3   :  { %1120 = vmatpush3.bf16.msra.mxu0 %v1142_v0  ;;  %1123 = vmatprep.mubr.msk.bf16.mxu0 %vm110_vm0, %v1144_v2  ;;  %v1148_v6 = vld [vmem:[%s1926_s0 + $0x20] sm:$0xff]  }
   0x4   :  { %1121 = vmatprep.subr.bf16.mxu0 %v1143_v1 }
   0x7   :  { %1122 = vmatpush3.bf16.msra.mxu0 %v1143_v1 }
   0xa   :  { %1124 = vmatmul.mubr.msk.bf16.vlgmr.msra.gmra.mxu0 %vm110_vm0, %v1145_v3 }
   0xb   :  { %1127 = vmatprep.mubr.msk.bf16.mxu0 %vm110_vm0, %v1146_v4 }
   0xc   :  { %13 = vsyncpa [#allocation3], 0  ;;  %v1149_v7 = vld [vmem:[%s1926_s0 + $0x28] sm:$0xff]   ;;  %v1150_v8 = vld [vmem:[%s1926_s0 + $0x30] sm:$0xff]   ;;  %v1295_v26 = vmov 0   ;;  %vm902_vm1 = vcmask 523264  }
   0xd   :  { %v1151_v9 = vld [vmem:[%s1926_s0 + $0x38] sm:$0xff]   ;;  %v1155_v12 = vld [vmem:[%s1930_s4 + $0x64] ss:$8 sps:$4 sm:$0xff]   ;;  %v1157_v13 = vld [vmem:[%s1930_s4 + $0x60] ss:$8 sps:$4 sm:$0xff]   ;;  %524 = vmatprep.mubr.bf16.mxu1 %v1295_v26  ;;  %1141 = vset.pattern.permute.xlu0 %v1295_v26  ;;  %vm1033_vm3 = vcmask 1042432  }
   0xe   :  { %v1152_v10 = vld [vmem:[%s1930_s4 + $0x74] ss:$8 sps:$4 sm:$0xff]   ;;  %v1154_v11 = vld [vmem:[%s1930_s4 + $0x70] ss:$8 sps:$4 sm:$0xff]   ;;  %v1161_v16 = vld [vmem:[%s1930_s4 + $0x44] ss:$8 sps:$4 sm:$0xff]  }
   0xf   :  { %492 = vmatprep.subr.bf16.mxu1 %v1152_v10  ;;  %v1158_v14 = vld [vmem:[%s1930_s4 + $0x54] ss:$8 sps:$4 sm:$0xff]   ;;  %v1160_v15 = vld [vmem:[%s1930_s4 + $0x50] ss:$8 sps:$4 sm:$0xff]   ;;  %v1163_v17 = vld [vmem:[%s1930_s4 + $0x40] ss:$8 sps:$4 sm:$0xff]  }
  0x10   :  { %493 = vmatpush1.bf16.msra.mxu1 %v1154_v11  ;;  %v1164_v18 = vld [vmem:[%s1930_s4 + $0x34] ss:$8 sps:$4 sm:$0xff]   ;;  %v1166_v19 = vld [vmem:[%s1930_s4 + $0x30] ss:$8 sps:$4 sm:$0xff]   ;;  %v1167_v20 = vld [vmem:[%s1930_s4 + $0x24] ss:$8 sps:$4 sm:$0xff]  }
  0x11   :  { %494 = vmatprep.subr.bf16.mxu1 %v1155_v12  ;;  %v1169_v21 = vld [vmem:[%s1930_s4 + $0x20] ss:$8 sps:$4 sm:$0xff]   ;;  %v1170_v22 = vld [vmem:[%s1930_s4 + $0x14] ss:$8 sps:$4 sm:$0xff]   ;;  %v1172_v23 = vld [vmem:[%s1930_s4 + $0x10] ss:$8 sps:$4 sm:$0xff]  }
  0x12   :  { %1128 = vmatmul.mubr.msk.bf16.gmra.mxu0 %vm110_vm0, %v1147_v5  ;;  %v1173_v24 = vld [vmem:[%s1930_s4 + $0x4] ss:$8 sps:$4 sm:$0xff]   ;;  %v1175_v25 = vld [vmem:[%s1930_s4] ss:$8 sps:$4 sm:$0xff]   ;;  %s1296_s14 = smov [#allocation2]  }
  0x13   :  { %1131 = vmatprep.mubr.msk.bf16.mxu0 %vm110_vm0, %v1148_v6  ;;  %v1433_v27 = vld [vmem:[%s1929_s3] ss:$0 sm:$0xff]  ;;  %s1048_s2 = sshll.u32 %s1296_s14, 4  ;;  %s1049_s2 = int_to_ptr.vmem [resolvable:$true] %s1048_s2 }
  0x14   :  { %495 = vmatpush1.bf16.msra.mxu1 %v1157_v13  ;;  %s1273_s15 = scalar_lea.vmem %s1049_s2, 16  ;;  %p1278_p1 = scmp.lt.s32.totalorder %s1049_s2, %s1049_s2 }
  0x15   :  { %496 = vmatprep.subr.bf16.mxu1 %v1158_v14  ;;  %p1274_p0 = scmp.ne.s32.totalorder %s1049_s2, %s1273_s15 }
  0x18   :  { %497 = vmatpush1.bf16.msra.mxu1 %v1160_v15 }
  0x19   :  { %498 = vmatprep.subr.bf16.mxu1 %v1161_v16 }
  0x1a   :  { %1132 = vmatmul.mubr.msk.bf16.gmra.mxu0 %vm110_vm0, %v1149_v7 }
  0x1b   :  { %1135 = vmatprep.mubr.msk.bf16.mxu0 %vm110_vm0, %v1150_v8 }
  0x1c   :  { %499 = vmatpush1.bf16.msra.mxu1 %v1163_v17 }
  0x1d   :  { %500 = vmatprep.subr.bf16.mxu1 %v1164_v18 }
  0x20   :  { %501 = vmatpush1.bf16.msra.mxu1 %v1166_v19 }
  0x21   :  { %502 = vmatprep.subr.bf16.mxu1 %v1167_v20 }
  0x22   :  { %1136 = vmatmul.mubr.msk.bf16.gmra.mxu0 %vm110_vm0, %v1151_v9 }
  0x24   :  { %503 = vmatpush1.bf16.msra.mxu1 %v1169_v21 }
  0x25   :  { %504 = vmatprep.subr.bf16.mxu1 %v1170_v22 }
  0x28   :  { %505 = vmatpush1.bf16.msra.mxu1 %v1172_v23 }
  0x29   :  { %506 = vmatprep.subr.bf16.mxu1 %v1173_v24 }
  0x2c   :  { %507 = vmatpush1.bf16.msra.mxu1 %v1175_v25 }
  0xca   :  { %v1125_v28 = vpop.f32.mrf.mxu0 }
  0xcb   :  { %v1436_v29 = vadd.f32 %v1125_v28, %v1433_v27 }
  0xcc   :  { %v169_v30 = vpop.f32.mrf.mxu0 }
  0xcd   :  { %v234_v31 = vmul.f32 %v1436_v29, %v1436_v29  ;;  %v1441_v32 = vadd.f32 %v1433_v27, %v169_v30 }
  0xce   :  { %v1126_v33 = vpop.f32.mrf.mxu0 }
  0xcf   :  { %v250_v34 = vmul.f32 %v234_v31, %v1436_v29  ;;  %v232_v35 = vmul.f32 %v1441_v32, %v1441_v32  ;;  %v1447_v36 = vadd.f32 %v1126_v33, %v1433_v27 }
  0xd0   :  { %v172_v37 = vpop.f32.mrf.mxu0 }
  0xd1   :  { %v248_v38 = vmul.f32 %v232_v35, %v1441_v32  ;;  %v235_v39 = vmul.f32 %v1447_v36, %v1447_v36  ;;  %v1453_v40 = vadd.f32 %v1433_v27, %v172_v37  ;;  %v266_v42 = vmul.f32 0.044715, %v250_v34 }
  0xd2   :  { %v1129_v41 = vpop.f32.mrf.mxu0 }
  0xd3   :  { %v264_v43 = vmul.f32 0.044715, %v248_v38  ;;  %v251_v44 = vmul.f32 %v235_v39, %v1447_v36  ;;  %v233_v45 = vmul.f32 %v1453_v40, %v1453_v40  ;;  %v1461_v50 = vadd.f32 %v1129_v41, %v1433_v27 }
  0xd4   :  { %v185_v46 = vpop.f32.mrf.mxu0  ;;  %v282_v53 = vadd.f32 %v266_v42, %v1436_v29 }
  0xd5   :  { %v280_v47 = vadd.f32 %v264_v43, %v1441_v32  ;;  %v267_v48 = vmul.f32 0.044715, %v251_v44  ;;  %v249_v49 = vmul.f32 %v233_v45, %v1453_v40  ;;  %v1464_v51 = vadd.f32 %v1433_v27, %v185_v46 }
  0xd6   :  { %v1130_v52 = vpop.f32.mrf.mxu0  ;;  %v238_v63 = vmul.f32 %v1461_v50, %v1461_v50  ;;  %v298_v3 = vmul.f32 0.7978846, %v282_v53 }
  0xd7   :  { %v296_v54 = vmul.f32 0.7978846, %v280_v47  ;;  %v283_v55 = vadd.f32 %v267_v48, %v1447_v36  ;;  %v265_v56 = vmul.f32 0.044715, %v249_v49  ;;  %v236_v57 = vmul.f32 %v1464_v51, %v1464_v51 }
  0xd8   :  { %v1471_v58 = vadd.f32 %v1130_v52, %v1433_v27  ;;  %v188_v59 = vpop.f32.mrf.mxu0  ;;  %v254_v10 = vmul.f32 %v238_v63, %v1461_v50 }
  0xd9   :  { %1177 = vtanh.f32 %v296_v54  ;;  %v299_v60 = vmul.f32 0.7978846, %v283_v55  ;;  %v281_v61 = vadd.f32 %v265_v56, %v1453_v40  ;;  %v1475_v62 = vadd.f32 %v1433_v27, %v188_v59 }
  0xda   :  { %v252_v0 = vmul.f32 %v236_v57, %v1464_v51  ;;  %v239_v1 = vmul.f32 %v1471_v58, %v1471_v58  ;;  %v1133_v2 = vpop.f32.mrf.mxu0  ;;  %v270_v18 = vmul.f32 0.044715, %v254_v10 }
  0xdb   :  { %v297_v4 = vmul.f32 0.7978846, %v281_v61  ;;  %v237_v5 = vmul.f32 %v1475_v62, %v1475_v62  ;;  %1179 = vtanh.f32 %v299_v60  ;;  %v1505_v34 = vadd.f32 %v1133_v2, %v1433_v27 }
  0xdc   :  { %v268_v6 = vmul.f32 0.044715, %v252_v0  ;;  %v255_v7 = vmul.f32 %v239_v1, %v1471_v58  ;;  %v201_v8 = vpop.f32.mrf.mxu0  ;;  %v286_v33 = vadd.f32 %v270_v18, %v1461_v50 }
  0xdd   :  { %1181 = vtanh.f32 %v297_v4  ;;  %v253_v9 = vmul.f32 %v237_v5, %v1475_v62  ;;  %v1488_v11 = vadd.f32 %v1433_v27, %v201_v8  ;;  %v242_v47 = vmul.f32 %v1505_v34, %v1505_v34 }
  0xde   :  { %v1134_v12 = vpop.f32.mrf.mxu0  ;;  %1183 = vtanh.f32 %v298_v3  ;;  %v284_v13 = vadd.f32 %v268_v6, %v1464_v51  ;;  %v271_v15 = vmul.f32 0.044715, %v255_v7  ;;  %v302_v46 = vmul.f32 0.7978846, %v286_v33 }
  0xdf   :  { %v269_v14 = vmul.f32 0.044715, %v253_v9  ;;  %v240_v19 = vmul.f32 %v1488_v11, %v1488_v11  ;;  %v1499_v25 = vadd.f32 %v1134_v12, %v1433_v27  ;;  %v258_v61 = vmul.f32 %v242_v47, %v1505_v34 }
  0xe0   :  { %v204_v16 = vpop.f32.mrf.mxu0  ;;  %v300_v22 = vmul.f32 0.7978846, %v284_v13  ;;  %v287_v24 = vadd.f32 %v271_v15, %v1471_v58 }
  0xe1   :  { %v285_v17 = vadd.f32 %v269_v14, %v1475_v62  ;;  %v1495_v20 = vadd.f32 %v1433_v27, %v204_v16  ;;  %v256_v35 = vmul.f32 %v240_v19, %v1488_v11  ;;  %v243_v41 = vmul.f32 %v1499_v25, %v1499_v25 }
  0xe2   :  { %v1137_v21 = vpop.f32.mrf.mxu0  ;;  %v303_v39 = vmul.f32 0.7978846, %v287_v24  ;;  %v274_v10 = vmul.f32 0.044715, %v258_v61 }
  0xe3   :  { %v301_v23 = vmul.f32 0.7978846, %v285_v17  ;;  %v241_v28 = vmul.f32 %v1495_v20, %v1495_v20  ;;  %v272_v48 = vmul.f32 0.044715, %v256_v35  ;;  %v259_v55 = vmul.f32 %v243_v41, %v1499_v25 }
  0xe4   :  { %v217_v30 = vpop.f32.mrf.mxu0  ;;  %v290_v19 = vadd.f32 %v274_v10, %v1505_v34 }
  0xe5   :  { %1185 = vtanh.f32 %v301_v23  ;;  %v257_v37 = vmul.f32 %v241_v28, %v1495_v20  ;;  %v288_v63 = vadd.f32 %v272_v48, %v1488_v11  ;;  %v1521_v0 = vadd.f32 %v1433_v27, %v217_v30 }
  0xe6   :  { %v1178_v31 = vpop.eup %1177  ;;  %v1138_v38 = vpop.f32.mrf.mxu0  ;;  %1187 = vtanh.f32 %v300_v22  ;;  %v275_v4 = vmul.f32 0.044715, %v259_v55  ;;  %v1538_v22 = vadd.f32 %v1137_v21, %v1433_v27 }
  0xe7   :  { %v328_v42 = vadd.f32 1.0, %v1178_v31  ;;  %v273_v44 = vmul.f32 0.044715, %v257_v37  ;;  %1189 = vtanh.f32 %v303_v39  ;;  %v304_v12 = vmul.f32 0.7978846, %v288_v63 }
  0xe8   :  { %v1180_v43 = vpop.eup %1179  ;;  %v220_v49 = vpop.f32.mrf.mxu0  ;;  %1191 = vtanh.f32 %v302_v46  ;;  %v244_v13 = vmul.f32 %v1521_v0, %v1521_v0 }
  0xe9   :  { %v344_v53 = vmul.f32 0.5, %v328_v42  ;;  %v289_v56 = vadd.f32 %v273_v44, %v1495_v20  ;;  %v1516_v57 = vadd.f32 %v1433_v27, %v220_v49  ;;  %v331_v60 = vadd.f32 1.0, %v1180_v43 }
  0xea   :  { %v1182_v45 = vpop.eup %1181  ;;  %v260_v23 = vmul.f32 %v244_v13, %v1521_v0 }
  0xeb   :  { %v329_v52 = vadd.f32 1.0, %v1182_v45  ;;  %v1184_v54 = vpop.eup %1183  ;;  %v360_v1 = vmul.f32 %v344_v53, %v1441_v32  ;;  %v305_v5 = vmul.f32 0.7978846, %v289_v56  ;;  %v245_v6 = vmul.f32 %v1516_v57, %v1516_v57 }
  0xec   :  { %v330_v3 = vadd.f32 1.0, %v1184_v54  ;;  %v347_v8 = vmul.f32 0.5, %v331_v60  ;;  %v291_v32 = vadd.f32 %v275_v4, %v1499_v25  ;;  %v276_v21 = vmul.f32 0.044715, %v260_v23 }
  0xed   :  { %v345_v59 = vmul.f32 0.5, %v329_v52  ;;  %1193 = vtanh.f32 %v305_v5  ;;  %v261_v16 = vmul.f32 %v245_v6, %v1516_v57 }
  0xee   :  { %v346_v14 = vmul.f32 0.5, %v330_v3  ;;  %v363_v17 = vmul.f32 %v347_v8, %v1447_v36  ;;  %1195 = vtanh.f32 %v304_v12  ;;  %v307_v30 = vmul.f32 0.7978846, %v291_v32 }
  0xef   :  { %v361_v2 = vmul.f32 %v345_v59, %v1453_v40  ;;  %v1531_v40 = vadd.f32 %v1138_v38, %v1433_v27  ;;  %v277_v35 = vmul.f32 0.044715, %v261_v16  ;;  %v306_v38 = vmul.f32 0.7978846, %v290_v19 }
  0xf0   :  { %v362_v24 = vmul.f32 %v346_v14, %v1436_v29  ;;  %v246_v27 = vmul.f32 %v1538_v22, %v1538_v22  ;;  %1197 = vtanh.f32 %v307_v30  ;;  %v292_v46 = vadd.f32 %v276_v21, %v1521_v0 }
  0xf1   :  { %v376_v7 = vpack.c.bf16 %v361_v2, %v360_v1  ;;  %v247_v33 = vmul.f32 %v1531_v40, %v1531_v40  ;;  %v293_v42 = vadd.f32 %v277_v35, %v1516_v57  ;;  %1199 = vtanh.f32 %v306_v38 }
  0xf2   :  { %v1186_v9 = vpop.eup %1185  ;;  %v377_v37 = vpack.c.bf16 %v363_v17, %v362_v24  ;;  %v262_v45 = vmul.f32 %v246_v27, %v1538_v22  ;;  %v308_v59 = vmul.f32 0.7978846, %v292_v46 }
  0xf3   :  { %525 = vmatmul.mubr.bf16.vlgmr.msra.gmra.mxu1 %v376_v7  ;;  %v1188_v15 = vpop.eup %1187  ;;  %v333_v18 = vadd.f32 1.0, %v1186_v9  ;;  %v263_v29 = vmul.f32 %v247_v33, %v1531_v40  ;;  %v309_v52 = vmul.f32 0.7978846, %v293_v42 }
  0xf4   :  { %534 = vmatprep.mubr.bf16.mxu1 %v1295_v26  ;;  %v332_v28 = vadd.f32 1.0, %v1188_v15  ;;  %v1190_v31 = vpop.eup %1189  ;;  %v278_v56 = vmul.f32 0.044715, %v262_v45 }
  0xf5   :  { %v349_v36 = vmul.f32 0.5, %v333_v18  ;;  %v1192_v39 = vpop.eup %1191  ;;  %v335_v44 = vadd.f32 1.0, %v1190_v31  ;;  %v279_v49 = vmul.f32 0.044715, %v263_v29  ;;  %1201 = vtanh.f32 %v309_v52 }
  0xf6   :  { %v348_v41 = vmul.f32 0.5, %v332_v28  ;;  %v334_v48 = vadd.f32 1.0, %v1192_v39  ;;  %1203 = vtanh.f32 %v308_v59 }
  0xf7   :  { %v365_v43 = vmul.f32 %v349_v36, %v1475_v62  ;;  %v351_v54 = vmul.f32 0.5, %v335_v44  ;;  %v295_v62 = vadd.f32 %v279_v49, %v1531_v40 }
  0xf8   :  { %v364_v47 = vmul.f32 %v348_v41, %v1464_v51  ;;  %v350_v60 = vmul.f32 0.5, %v334_v48  ;;  %v294_v51 = vadd.f32 %v278_v56, %v1538_v22 }
  0xf9   :  { %v367_v63 = vmul.f32 %v351_v54, %v1471_v58  ;;  %v311_v5 = vmul.f32 0.7978846, %v295_v62 }
  0xfa   :  { %v378_v53 = vpack.c.bf16 %v365_v43, %v364_v47  ;;  %v1194_v55 = vpop.eup %1193  ;;  %v366_v2 = vmul.f32 %v350_v60, %v1461_v50  ;;  %v310_v9 = vmul.f32 0.7978846, %v294_v51  ;;  %v400_v51 = vld [vmem:[%s1931_s5] sm:$0x3] }
  0xfb   :  { %535 = vmatmul.mubr.bf16.gmra.mxu1 %v377_v37  ;;  %v1196_v61 = vpop.eup %1195  ;;  %v337_v1 = vadd.f32 1.0, %v1194_v55  ;;  %1205 = vtanh.f32 %v311_v5  ;;  %v402_v55 = vlaneseq }
  0xfc   :  { %544 = vmatprep.mubr.bf16.mxu1 %v1295_v26  ;;  %v336_v3 = vadd.f32 1.0, %v1196_v61  ;;  %v379_v6 = vpack.c.bf16 %v367_v63, %v366_v2  ;;  %1207 = vtanh.f32 %v310_v9 }
  0xfd   :  { %v1198_v4 = vpop.eup %1197  ;;  %v353_v7 = vmul.f32 0.5, %v337_v1  ;;  %v1585_v60 = vshrl.u32 %v402_v55, 7 }
  0xfe   :  { %v1200_v8 = vpop.eup %1199  ;;  %v352_v10 = vmul.f32 0.5, %v336_v3  ;;  %v339_v12 = vadd.f32 1.0, %v1198_v4 }
  0xff   :  { %v369_v58 = vmul.f32 %v353_v7, %v1495_v20  ;;  %v338_v14 = vadd.f32 1.0, %v1200_v8  ;;  %1946 = vst [vmem:[#allocation5_spill] sm:$0xff] %v1585_v60  ;;  %v404_v63 = vsub.s32 0, %v1585_v60  ;;  %v408_v2 = vsub.s32 1, %v1585_v60 }
 0x100   :  { %v368_v13 = vmul.f32 %v352_v10, %v1488_v11  ;;  %v355_v15 = vmul.f32 0.5, %v339_v12 }
 0x101   :  { %v354_v16 = vmul.f32 0.5, %v338_v14  ;;  %v1596_v4 = vrot.slane %v400_v51, %v404_v63 }
 0x102   :  { %v380_v50 = vpack.c.bf16 %v369_v58, %v368_v13  ;;  %v1202_v32 = vpop.eup %1201  ;;  %v371_v18 = vmul.f32 %v355_v15, %v1499_v25 }
 0x103   :  { %545 = vmatmul.mubr.bf16.gmra.mxu1 %v378_v53  ;;  %v1204_v17 = vpop.eup %1203  ;;  %v341_v19 = vadd.f32 1.0, %v1202_v32  ;;  %v370_v23 = vmul.f32 %v354_v16, %v1505_v34  ;;  %v894_v53 = vld [vmem:[%s1933_s7] sm:$0x7] }
 0x104   :  { %554 = vmatprep.mubr.bf16.mxu1 %v1295_v26  ;;  %v340_v24 = vadd.f32 1.0, %v1204_v17  ;;  %897 = vperm.xlu0 %1141, %v894_v53  }
 0x105   :  { %v381_v20 = vpack.c.bf16 %v371_v18, %v370_v23  ;;  %v357_v28 = vmul.f32 0.5, %v341_v19 }
 0x106   :  { %v356_v11 = vmul.f32 0.5, %v340_v24 }
 0x107   :  { %v373_v33 = vmul.f32 %v357_v28, %v1516_v57 }
 0x108   :  { %v1206_v30 = vpop.eup %1205  ;;  %v372_v37 = vmul.f32 %v356_v11, %v1521_v0 }
 0x109   :  { %v1208_v31 = vpop.eup %1207  ;;  %v343_v35 = vadd.f32 1.0, %v1206_v30 }
 0x10a   :  { %v342_v36 = vadd.f32 1.0, %v1208_v31  ;;  %v382_v38 = vpack.c.bf16 %v373_v33, %v372_v37 }
 0x10b   :  { %555 = vmatmul.mubr.bf16.gmra.mxu1 %v379_v6  ;;  %v359_v25 = vmul.f32 0.5, %v343_v35  ;;  %v1598_v6 = vrot.slane %v400_v51, %v408_v2 }
 0x10c   :  { %564 = vmatprep.mubr.bf16.mxu1 %v1295_v26  ;;  %v358_v39 = vmul.f32 0.5, %v342_v36 }
 0x10d   :  { %v375_v34 = vmul.f32 %v359_v25, %v1531_v40 }
 0x10e   :  { %v374_v27 = vmul.f32 %v358_v39, %v1538_v22 }
 0x110   :  { %v383_v21 = vpack.c.bf16 %v375_v34, %v374_v27 }
 0x113   :  { %565 = vmatmul.mubr.bf16.gmra.mxu1 %v380_v50 }
 0x114   :  { %574 = vmatprep.mubr.bf16.mxu1 %v1295_v26 }
 0x11b   :  { %575 = vmatmul.mubr.bf16.gmra.mxu1 %v381_v20 }
 0x11c   :  { %584 = vmatprep.mubr.bf16.mxu1 %v1295_v26 }
 0x123   :  { %585 = vmatmul.mubr.bf16.gmra.mxu1 %v382_v38 }
 0x124   :  { %594 = vmatprep.mubr.bf16.mxu1 %v1295_v26 }
 0x12b   :  { %595 = vmatmul.mubr.bf16.gmra.mxu1 %v383_v21 }
 0x1b3   :  { %v526_v41 = vpop.f32.mrf.mxu1 }
 0x1b4   :  { %v1601_v8 = vadd.f32 %v526_v41, %v1596_v4 }
 0x1b5   :  { %v528_v29 = vpop.f32.mrf.mxu1 }
 0x1b6   :  { %1947 = vst [vmem:[#allocation6_spill] sm:$0xff] %v1601_v8  ;;  %v1604_v10 = vadd.f32 %v528_v29, %v1598_v6  ;;  %v1626_v16 = vmul.f32 %v1601_v8, %v1601_v8 }
 0x1b7   :  { %v530_v42 = vpop.f32.mrf.mxu1 }
 0x1b8   :  { %v1607_v58 = vadd.f32 %v530_v42, %v1596_v4  ;;  %1949 = vst [vmem:[#allocation8_spill] sm:$0xff] %v1626_v16  ;;  %v1636_v23 = vmul.f32 %v1604_v10, %v1604_v10 }
 0x1b9   :  { %v532_v57 = vpop.f32.mrf.mxu1 }
 0x1ba   :  { %1948 = vst [vmem:[#allocation7_spill] sm:$0xff] %v1607_v58  ;;  %v1610_v12 = vadd.f32 %v532_v57, %v1598_v6  ;;  %v1640_v24 = vmul.f32 %v1607_v58, %v1607_v58 }
 0x1bb   :  { %v536_v43 = vpop.f32.mrf.mxu1 }
 0x1bc   :  { %v1613_v13 = vadd.f32 %v536_v43, %v1596_v4  ;;  %1950 = vst [vmem:[#allocation9_spill] sm:$0xff] %v1640_v24  ;;  %v1644_v20 = vmul.f32 %v1610_v12, %v1610_v12 }
 0x1bd   :  { %v538_v44 = vpop.f32.mrf.mxu1 }
 0x1be   :  { %v1616_v14 = vadd.f32 %v538_v44, %v1598_v6  ;;  %v1648_v28 = vmul.f32 %v1613_v13, %v1613_v13 }
 0x1bf   :  { %v540_v0 = vpop.f32.mrf.mxu1 }
 0x1c0   :  { %v1619_v50 = vadd.f32 %v540_v0, %v1596_v4  ;;  %v1652_v30 = vmul.f32 %v1616_v14, %v1616_v14 }
 0x1c1   :  { %v542_v45 = vpop.f32.mrf.mxu1 }
 0x1c2   :  { %v1622_v15 = vadd.f32 %v542_v45, %v1598_v6  ;;  %v1656_v11 = vmul.f32 %v1619_v50, %v1619_v50 }
 0x1c3   :  { %v546_v46 = vpop.f32.mrf.mxu1 }
 0x1c4   :  { %v1660_v31 = vmul.f32 %v1622_v15, %v1622_v15  ;;  %v1666_v37 = vadd.f32 %v546_v46, %v1596_v4 }
 0x1c5   :  { %v548_v47 = vpop.f32.mrf.mxu1 }
 0x1c6   :  { %v1669_v36 = vadd.f32 %v548_v47, %v1598_v6 }
 0x1c7   :  { %v1570_v48 = vpop.f32.mrf.mxu1 }
 0x1c9   :  { %v1572_v49 = vpop.f32.mrf.mxu1 }
 0x1cb   :  { %v1574_v26 = vpop.f32.mrf.mxu1 }
 0x1cd   :  { %v1576_v40 = vpop.f32.mrf.mxu1 }
 0x1cf   :  { %v1578_v22 = vpop.f32.mrf.mxu1 }
 0x1d1   :  { %v562_v52 = vpop.f32.mrf.mxu1 }
 0x1d2   :  { %v1687_v29 = vadd.f32 %v562_v52, %v1598_v6 }
 0x1d3   :  { %v1583_v54 = vpop.f32.mrf.mxu1 }
 0x1d5   :  { %v568_v56 = vpop.f32.mrf.mxu1 }
 0x1d6   :  { %v1690_v42 = vadd.f32 %v568_v56, %v1598_v6 }
 0x1d7   :  { %v570_v59 = vpop.f32.mrf.mxu1 }
 0x1d8   :  { %1951 = vst [vmem:[#allocation10_spill] sm:$0xff] %v1690_v42  ;;  %v1698_v44 = vadd.f32 %v570_v59, %v1596_v4 }
 0x1d9   :  { %v1587_v61 = vpop.f32.mrf.mxu1 }
 0x1da   :  { %1952 = vst [vmem:[#allocation11_spill] sm:$0xff] %v1698_v44 }
 0x1db   :  { %v1589_v62 = vpop.f32.mrf.mxu1 }
 0x1dd   :  { %v578_v1 = vpop.f32.mrf.mxu1 }
 0x1de   :  { %v1701_v0 = vadd.f32 %v578_v1, %v1598_v6 }
 0x1df   :  { %v580_v3 = vpop.f32.mrf.mxu1 }
 0x1e0   :  { %1953 = vst [vmem:[#allocation12_spill] sm:$0xff] %v1701_v0  ;;  %v1704_v45 = vadd.f32 %v580_v3, %v1596_v4 }
 0x1e1   :  { %v582_v5 = vpop.f32.mrf.mxu1 }
 0x1e2   :  { %v1672_v38 = vadd.f32 %v582_v5, %v1598_v6 }
 0x1e3   :  { %v586_v7 = vpop.f32.mrf.mxu1 }
 0x1e4   :  { %v1678_v39 = vadd.f32 %v586_v7, %v1596_v4  ;;  %v628_v52 = vmul.f32 %v1672_v38, %v1672_v38 }
 0x1e5   :  { %v588_v9 = vpop.f32.mrf.mxu1 }
 0x1e6   :  { %v1629_v17 = vadd.f32 %v588_v9, %v1598_v6  ;;  %v629_v59 = vmul.f32 %v1678_v39, %v1678_v39 }
 0x1e7   :  { %v590_v32 = vpop.f32.mrf.mxu1 }
 0x1e8   :  { %v1632_v18 = vadd.f32 %v590_v32, %v1596_v4  ;;  %v630_v34 = vmul.f32 %v1629_v17, %v1629_v17  ;;  %v1727_v32 = vadd.f32 %v1587_v61, %v1598_v6  ;;  %v660_v61 = vmul.f32 %v628_v52, %v1672_v38 }
 0x1e9   :  { %v592_v19 = vpop.f32.mrf.mxu1 }
 0x1ea   :  { %v1663_v33 = vadd.f32 %v592_v19, %v1598_v6  ;;  %v631_v27 = vmul.f32 %v1632_v18, %v1632_v18  ;;  %v662_v63 = vmul.f32 %v630_v34, %v1629_v17  ;;  %1954 = vst [vmem:[#allocation13_spill] sm:$0xff] %v1727_v32  ;;  %v1731_v19 = vadd.f32 %v1589_v62, %v1596_v4 }
 0x1eb   :  { %v596_v35 = vpop.f32.mrf.mxu1  ;;  %v692_v16 = vmul.f32 0.044715, %v660_v61 }
 0x1ec   :  { %v1675_v25 = vadd.f32 %v596_v35, %v1596_v4  ;;  %v632_v21 = vmul.f32 %v1663_v33, %v1663_v33  ;;  %v663_v1 = vmul.f32 %v631_v27, %v1632_v18  ;;  %1955 = vst [vmem:[#allocation14_spill] sm:$0xff] %v1731_v19  ;;  %v626_v35 = vmul.f32 %v1701_v0, %v1701_v0 }
 0x1ed   :  { %v598_v41 = vpop.f32.mrf.mxu1  ;;  %v627_v27 = vmul.f32 %v1704_v45, %v1704_v45 }
 0x1ee   :  { %v633_v57 = vmul.f32 %v1675_v25, %v1675_v25  ;;  %v1695_v43 = vadd.f32 %v598_v41, %v1598_v6  ;;  %v664_v46 = vmul.f32 %v632_v21, %v1663_v33  ;;  %v695_v62 = vmul.f32 0.044715, %v663_v1 }
 0x1ef   :  { %v600_v47 = vpop.f32.mrf.mxu1  ;;  %v658_v60 = vmul.f32 %v626_v35, %v1701_v0  ;;  %v1758_v35 = vadd.f32 %v1583_v54, %v1596_v4 }
 0x1f0   :  { %v665_v53 = vmul.f32 %v633_v57, %v1675_v25  ;;  %v634_v55 = vmul.f32 %v1695_v43, %v1695_v43  ;;  %v1713_v56 = vadd.f32 %v600_v47, %v1596_v4  ;;  %v696_v51 = vmul.f32 0.044715, %v664_v46 }
 0x1f1   :  { %v602_v2 = vpop.f32.mrf.mxu1  ;;  %v661_v46 = vmul.f32 %v629_v59, %v1678_v39  ;;  %v659_v59 = vmul.f32 %v627_v27, %v1704_v45  ;;  %v623_v27 = vmul.f32 %v1698_v44, %v1698_v44  ;;  %v690_v54 = vmul.f32 0.044715, %v658_v60 }
 0x1f2   :  { %v697_v3 = vmul.f32 0.044715, %v665_v53  ;;  %v666_v5 = vmul.f32 %v634_v55, %v1695_v43  ;;  %v635_v7 = vmul.f32 %v1713_v56, %v1713_v56  ;;  %v1723_v9 = vadd.f32 %v602_v2, %v1598_v6 }
 0x1f3   :  { %v728_v34 = vadd.f32 %v696_v51, %v1663_v33  ;;  %v694_v53 = vmul.f32 0.044715, %v662_v63  ;;  %v620_v60 = vmul.f32 %v1687_v29, %v1687_v29 }
 0x1f4   :  { %v698_v21 = vmul.f32 0.044715, %v666_v5  ;;  %v667_v41 = vmul.f32 %v635_v7, %v1713_v56  ;;  %v636_v57 = vmul.f32 %v1723_v9, %v1723_v9  ;;  %v729_v47 = vadd.f32 %v697_v3, %v1675_v25 }
 0x1f5   :  { %v624_v5 = vmul.f32 %v1727_v32, %v1727_v32  ;;  %v625_v7 = vmul.f32 %v1731_v19, %v1731_v19  ;;  %v760_v52 = vmul.f32 0.7978846, %v728_v34  ;;  %v726_v8 = vadd.f32 %v694_v53, %v1629_v17 }
 0x1f6   :  { %v730_v55 = vadd.f32 %v698_v21, %v1695_v43  ;;  %v699_v51 = vmul.f32 0.044715, %v667_v41  ;;  %v668_v2 = vmul.f32 %v636_v57, %v1723_v9  ;;  %v693_v21 = vmul.f32 0.044715, %v661_v46 }
 0x1f7   :  { %v727_v41 = vadd.f32 %v695_v62, %v1632_v18  ;;  %v761_v57 = vmul.f32 0.7978846, %v729_v47  ;;  %v622_v34 = vmul.f32 %v1690_v42, %v1690_v42  ;;  %v656_v61 = vmul.f32 %v624_v5, %v1727_v32 }
 0x1f8   :  { %v762_v1 = vmul.f32 0.7978846, %v730_v55  ;;  %v731_v3 = vadd.f32 %v699_v51, %v1713_v56  ;;  %v700_v63 = vmul.f32 0.044715, %v668_v2  ;;  %v657_v46 = vmul.f32 %v625_v7, %v1731_v19 }
 0x1f9   :  { %v691_v47 = vmul.f32 0.044715, %v659_v59  ;;  %v725_v53 = vadd.f32 %v693_v21, %v1678_v39  ;;  %v759_v55 = vmul.f32 0.7978846, %v727_v41  ;;  %v724_v51 = vadd.f32 %v692_v16, %v1672_v38 }
 0x1fa   :  { %1209 = vtanh.f32 %v762_v1  ;;  %v763_v24 = vmul.f32 0.7978846, %v731_v3  ;;  %v732_v58 = vadd.f32 %v700_v63, %v1723_v9  ;;  %v758_v2 = vmul.f32 0.7978846, %v726_v8 }
 0x1fb   :  { %1211 = vtanh.f32 %v760_v52  ;;  %v1770_v1 = vmul.f32 %v1666_v37, %v1666_v37  ;;  %v614_v5 = vmul.f32 %v1669_v36, %v1669_v36  ;;  %v621_v8 = vmul.f32 %v1758_v35, %v1758_v35 }
 0x1fc   :  { %1213 = vtanh.f32 %v763_v24  ;;  %v764_v62 = vmul.f32 0.7978846, %v732_v58  ;;  %v1776_v58 = vadd.f32 %v1576_v40, %v1598_v6  ;;  %v1780_v24 = vadd.f32 %v1578_v22, %v1596_v4 }
 0x1fd   :  { %1215 = vtanh.f32 %v761_v57  ;;  %v654_v16 = vmul.f32 %v622_v34, %v1690_v42  ;;  %v655_v7 = vmul.f32 %v623_v27, %v1698_v44  ;;  %v689_v52 = vmul.f32 0.044715, %v657_v46 }
 0x1fe   :  { %1217 = vtanh.f32 %v764_v62  ;;  %v723_v59 = vadd.f32 %v691_v47, %v1704_v45  ;;  %v757_v3 = vmul.f32 0.7978846, %v725_v53  ;;  %v688_v40 = vmul.f32 0.044715, %v656_v61 }
 0x1ff   :  { %1219 = vtanh.f32 %v759_v55  ;;  %v722_v63 = vadd.f32 %v690_v54, %v1701_v0  ;;  %v756_v22 = vmul.f32 0.7978846, %v724_v51  ;;  %v1792_v21 = vadd.f32 %v1572_v49, %v1598_v6 }
 0x200   :  { %1221 = vtanh.f32 %v758_v2  ;;  %v1796_v41 = vadd.f32 %v1574_v26, %v1596_v4  ;;  %v618_v57 = vmul.f32 %v1776_v58, %v1776_v58  ;;  %v619_v34 = vmul.f32 %v1780_v24, %v1780_v24 }
 0x201   :  { %v1804_v27 = vadd.f32 %v1570_v48, %v1596_v4  ;;  %v652_v61 = vmul.f32 %v620_v60, %v1687_v29  ;;  %v653_v46 = vmul.f32 %v621_v8, %v1758_v35  ;;  %v686_v49 = vmul.f32 0.044715, %v654_v16  ;;  %v1816_v48 = vld [vmem:[%s1932_s6] sm:$0x77] }
 0x202   :  { %v687_v6 = vmul.f32 0.044715, %v655_v7  ;;  %v721_v62 = vadd.f32 %v689_v52, %v1731_v19  ;;  %v755_v26 = vmul.f32 0.7978846, %v723_v59  ;;  %1223 = vtanh.f32 %v757_v3  ;;  %1956 = vst [vmem:[#allocation15_spill] sm:$0xff] %v1816_v48 }
 0x203   :  { %v1810_v47 = vmul.f32 %v614_v5, %v1669_v36  ;;  %v720_v53 = vadd.f32 %v688_v40, %v1727_v32  ;;  %v754_v55 = vmul.f32 0.7978846, %v722_v63  ;;  %1225 = vtanh.f32 %v756_v22 }
 0x204   :  { %v616_v54 = vmul.f32 %v1792_v21, %v1792_v21  ;;  %v617_v51 = vmul.f32 %v1796_v41, %v1796_v41  ;;  %v650_v2 = vmul.f32 %v618_v57, %v1776_v58  ;;  %v651_v5 = vmul.f32 %v619_v34, %v1780_v24 }
 0x205   :  { %v615_v8 = vmul.f32 %v1804_v27, %v1804_v27  ;;  %v684_v16 = vmul.f32 0.044715, %v652_v61  ;;  %v685_v7 = vmul.f32 0.044715, %v653_v46  ;;  %v718_v52 = vadd.f32 %v686_v49, %v1690_v42 }
 0x206   :  { %v719_v3 = vadd.f32 %v687_v6, %v1698_v44  ;;  %v753_v40 = vmul.f32 0.7978846, %v721_v62  ;;  %1227 = vtanh.f32 %v755_v26  ;;  %v901_v63 = vcombine.high %v1816_v48, %v1816_v48 }
 0x207   :  { %v1210_v4 = vpop.eup %1209  ;;  %v752_v57 = vmul.f32 0.7978846, %v720_v53  ;;  %1229 = vtanh.f32 %v754_v55  ;;  %v648_v0 = vmul.f32 %v616_v54, %v1792_v21  ;;  %v649_v61 = vmul.f32 %v617_v51, %v1796_v41 }
 0x208   :  { %v1212_v60 = vpop.eup %1211  ;;  %v826_v32 = vadd.f32 1.0, %v1210_v4  ;;  %v682_v46 = vmul.f32 0.044715, %v650_v2  ;;  %v683_v49 = vmul.f32 0.044715, %v651_v5  ;;  %1107 = vmatprep.mubr.msk.f32.mxu0 %vm902_vm1, %v901_v63  ;;  %v716_v6 = vadd.f32 %v684_v16, %v1687_v29 }
 0x209   :  { %v1214_v59 = vpop.eup %1213  ;;  %v717_v62 = vadd.f32 %v685_v7, %v1758_v35  ;;  %v750_v26 = vmul.f32 0.7978846, %v718_v52  ;;  %v751_v42 = vmul.f32 0.7978846, %v719_v3  ;;  %1231 = vtanh.f32 %v753_v40 }
 0x20a   :  { %v1216_v22 = vpop.eup %1215  ;;  %v827_v34 = vadd.f32 1.0, %v1214_v59  ;;  %1233 = vtanh.f32 %v752_v57  ;;  %v858_v54 = vmul.f32 0.5, %v826_v32  ;;  %v824_v44 = vadd.f32 1.0, %v1212_v60 }
 0x20b   :  { %v1218_v19 = vpop.eup %1217  ;;  %v825_v55 = vadd.f32 1.0, %v1216_v22  ;;  %v647_v2 = vmul.f32 %v615_v8, %v1804_v27  ;;  %v680_v5 = vmul.f32 0.044715, %v648_v0  ;;  %v681_v63 = vmul.f32 0.044715, %v649_v61 }
 0x20c   :  { %v828_v48 = vadd.f32 1.0, %v1218_v19  ;;  %v859_v53 = vmul.f32 0.5, %v827_v34  ;;  %v1220_v4 = vpop.eup %1219  ;;  %v714_v16 = vadd.f32 %v682_v46, %v1776_v58  ;;  %v715_v7 = vadd.f32 %v683_v49, %v1780_v24 }
 0x20d   :  { %v1222_v51 = vpop.eup %1221  ;;  %v748_v52 = vmul.f32 0.7978846, %v716_v6  ;;  %v749_v19 = vmul.f32 0.7978846, %v717_v62  ;;  %1235 = vtanh.f32 %v751_v42  ;;  %v857_v22 = vmul.f32 0.5, %v825_v55 }
 0x20e   :  { %v860_v59 = vmul.f32 0.5, %v828_v48  ;;  %v891_v40 = vmul.f32 %v859_v53, %v1713_v56  ;;  %v823_v48 = vadd.f32 1.0, %v1220_v4  ;;  %1237 = vtanh.f32 %v750_v26 }
 0x20f   :  { %v1224_v32 = vpop.eup %1223  ;;  %v890_v0 = vmul.f32 %v858_v54, %v1695_v43  ;;  %v856_v60 = vmul.f32 0.5, %v824_v44  ;;  %v822_v8 = vadd.f32 1.0, %v1222_v51  ;;  %v644_v34 = vmul.f32 %v1660_v31, %v1622_v15 }
 0x210   :  { %v892_v3 = vmul.f32 %v860_v59, %v1723_v9  ;;  %v1226_v57 = vpop.eup %1225  ;;  %v645_v9 = vmul.f32 %v1770_v1, %v1666_v37  ;;  %v678_v42 = vmul.f32 0.044715, %v1810_v47  ;;  %v679_v56 = vmul.f32 0.044715, %v647_v2 }
 0x211   :  { %v712_v61 = vadd.f32 %v680_v5, %v1792_v21  ;;  %v713_v46 = vadd.f32 %v681_v63, %v1796_v41  ;;  %v746_v49 = vmul.f32 0.7978846, %v714_v16  ;;  %v747_v6 = vmul.f32 0.7978846, %v715_v7 }
 0x212   :  { %1091 = vmatprep.subr.msk.mxu0 %vm902_vm1, %v892_v3  ;;  %1239 = vtanh.f32 %v749_v19  ;;  %v889_v43 = vmul.f32 %v857_v22, %v1675_v25  ;;  %v855_v44 = vmul.f32 0.5, %v823_v48  ;;  %v821_v31 = vadd.f32 1.0, %v1224_v32 }
 0x213   :  { %954 = vmatpush1.xpose.msra.mxu0 %v891_v40  ;;  %v1228_v62 = vpop.eup %1227  ;;  %1241 = vtanh.f32 %v748_v52  ;;  %v888_v1 = vmul.f32 %v856_v60, %v1663_v33  ;;  %v854_v47 = vmul.f32 0.5, %v822_v8  ;;  %v820_v26 = vadd.f32 1.0, %v1226_v57 }
 0x214   :  { %1092 = vmatprep.subr.msk.mxu0 %vm902_vm1, %v890_v0  ;;  %v1230_v53 = vpop.eup %1229  ;;  %v642_v55 = vmul.f32 %v1652_v30, %v1616_v14  ;;  %v643_v4 = vmul.f32 %v1656_v11, %v1619_v50  ;;  %v676_v59 = vmul.f32 0.044715, %v644_v34  ;;  %v677_v54 = vmul.f32 0.044715, %v645_v9 }
 0x215   :  { %v710_v25 = vadd.f32 %v678_v42, %v1669_v36  ;;  %v711_v51 = vadd.f32 %v679_v56, %v1804_v27  ;;  %v744_v2 = vmul.f32 0.7978846, %v712_v61  ;;  %v745_v5 = vmul.f32 0.7978846, %v713_v46  ;;  %v1957_v61 = vld [vmem:[#allocation7_spill] sm:$0xff]  ;;  %v1958_v46 = vld [vmem:[#allocation9_spill] sm:$0xff] }
 0x216   :  { %1243 = vtanh.f32 %v747_v6  ;;  %v887_v33 = vmul.f32 %v855_v44, %v1632_v18  ;;  %v853_v63 = vmul.f32 0.5, %v821_v31  ;;  %v819_v16 = vadd.f32 1.0, %v1228_v62  ;;  %v1232_v30 = vpop.eup %1231 }
 0x217   :  { %956 = vmatpush1.xpose.msra.mxu0 %v889_v43  ;;  %1245 = vtanh.f32 %v746_v49  ;;  %v886_v11 = vmul.f32 %v854_v47, %v1629_v17  ;;  %v852_v7 = vmul.f32 0.5, %v820_v26  ;;  %v818_v52 = vadd.f32 1.0, %v1230_v53  ;;  %v1234_v19 = vpop.eup %1233  ;;  %v1959_v26 = vld [vmem:[#allocation12_spill] sm:$0xff] }
 0x218   :  { %1093 = vmatprep.subr.msk.mxu0 %vm902_vm1, %v888_v1  ;;  %v640_v3 = vmul.f32 %v1644_v20, %v1610_v12  ;;  %v641_v40 = vmul.f32 %v1648_v28, %v1613_v13  ;;  %v674_v22 = vmul.f32 0.044715, %v642_v55  ;;  %v675_v48 = vmul.f32 0.044715, %v643_v4 }
 0x219   :  { %v708_v18 = vadd.f32 %v676_v59, %v1622_v15  ;;  %v709_v32 = vadd.f32 %v677_v54, %v1666_v37  ;;  %v742_v0 = vmul.f32 0.7978846, %v710_v25  ;;  %v743_v60 = vmul.f32 0.7978846, %v711_v51  ;;  %v1960_v54 = vld [vmem:[#allocation6_spill] sm:$0xff]  ;;  %v1961_v25 = vld [vmem:[#allocation8_spill] sm:$0xff] }
 0x21a   :  { %1247 = vtanh.f32 %v745_v5  ;;  %v885_v17 = vmul.f32 %v853_v63, %v1678_v39  ;;  %v851_v8 = vmul.f32 0.5, %v819_v16  ;;  %v817_v57 = vadd.f32 1.0, %v1232_v30  ;;  %v1236_v20 = vpop.eup %1235  ;;  %v1962_v30 = vld [vmem:[#allocation14_spill] sm:$0xff] }
 0x21b   :  { %958 = vmatpush1.xpose.msra.mxu0 %v887_v33  ;;  %1249 = vtanh.f32 %v744_v2  ;;  %v884_v28 = vmul.f32 %v852_v7, %v1672_v38  ;;  %v850_v34 = vmul.f32 0.5, %v818_v52  ;;  %v816_v9 = vadd.f32 1.0, %v1234_v19  ;;  %v1238_v42 = vpop.eup %1237 }
 0x21c   :  { %1094 = vmatprep.subr.msk.mxu0 %vm902_vm1, %v886_v11  ;;  %v638_v56 = vmul.f32 %v1636_v23, %v1604_v10  ;;  %v639_v49 = vmul.f32 %v1958_v46, %v1957_v61  ;;  %v672_v6 = vmul.f32 0.044715, %v640_v3  ;;  %v673_v43 = vmul.f32 0.044715, %v641_v40  ;;  %v1963_v3 = vld [vmem:[#allocation13_spill] sm:$0xff] }
 0x21d   :  { %v706_v39 = vadd.f32 %v674_v22, %v1616_v14  ;;  %v707_v44 = vadd.f32 %v675_v48, %v1619_v50  ;;  %v740_v31 = vmul.f32 0.7978846, %v708_v18  ;;  %v741_v62 = vmul.f32 0.7978846, %v709_v32 }
 0x21e   :  { %1251 = vtanh.f32 %v743_v60  ;;  %v883_v38 = vmul.f32 %v851_v8, %v1704_v45  ;;  %v849_v1 = vmul.f32 0.5, %v817_v57  ;;  %v815_v47 = vadd.f32 1.0, %v1236_v20  ;;  %v1964_v57 = vld [vmem:[#allocation11_spill] sm:$0xff] }
 0x21f   :  { %960 = vmatpush1.xpose.msra.mxu0 %v885_v17  ;;  %v1240_v23 = vpop.eup %1239  ;;  %1253 = vtanh.f32 %v742_v0  ;;  %v882_v53 = vmul.f32 %v850_v34, %v1959_v26  ;;  %v848_v55 = vmul.f32 0.5, %v816_v9  ;;  %v814_v4 = vadd.f32 1.0, %v1238_v42  ;;  %v1965_v42 = vld [vmem:[#allocation10_spill] sm:$0xff] }
 0x220   :  { %1095 = vmatprep.subr.msk.mxu0 %vm902_vm1, %v884_v28  ;;  %v1242_v59 = vpop.eup %1241  ;;  %v637_v51 = vmul.f32 %v1961_v25, %v1960_v54  ;;  %v670_v2 = vmul.f32 0.044715, %v638_v56  ;;  %v671_v5 = vmul.f32 0.044715, %v639_v49  ;;  %v704_v33 = vadd.f32 %v672_v6, %v1610_v12 }
 0x221   :  { %v705_v63 = vadd.f32 %v673_v43, %v1613_v13  ;;  %v738_v45 = vmul.f32 0.7978846, %v706_v39  ;;  %v739_v16 = vmul.f32 0.7978846, %v707_v44  ;;  %1255 = vtanh.f32 %v741_v62 }
 0x222   :  { %v881_v11 = vmul.f32 %v849_v1, %v1962_v30  ;;  %v847_v7 = vmul.f32 0.5, %v815_v47  ;;  %v813_v52 = vadd.f32 1.0, %v1240_v23  ;;  %1257 = vtanh.f32 %v740_v31 }
 0x223   :  { %962 = vmatpush1.xpose.msra.mxu0 %v883_v38  ;;  %v1244_v19 = vpop.eup %1243  ;;  %v880_v40 = vmul.f32 %v848_v55, %v1963_v3  ;;  %v846_v22 = vmul.f32 0.5, %v814_v4  ;;  %v812_v48 = vadd.f32 1.0, %v1242_v59  ;;  %v669_v32 = vmul.f32 0.044715, %v637_v51 }
 0x224   :  { %1096 = vmatprep.subr.msk.mxu0 %vm902_vm1, %v882_v53  ;;  %v1246_v18 = vpop.eup %1245  ;;  %v702_v0 = vadd.f32 %v670_v2, %v1604_v10  ;;  %v703_v60 = vadd.f32 %v671_v5, %v1957_v61  ;;  %v736_v17 = vmul.f32 0.7978846, %v704_v33  ;;  %v737_v8 = vmul.f32 0.7978846, %v705_v63 }
 0x225   :  { %1259 = vtanh.f32 %v739_v16  ;;  %v879_v20 = vmul.f32 %v847_v7, %v1964_v57  ;;  %v845_v28 = vmul.f32 0.5, %v813_v52  ;;  %v811_v34 = vadd.f32 1.0, %v1244_v19 }
 0x226   :  { %1261 = vtanh.f32 %v738_v45  ;;  %v878_v56 = vmul.f32 %v846_v22, %v1965_v42  ;;  %v844_v46 = vmul.f32 0.5, %v812_v48  ;;  %v810_v49 = vadd.f32 1.0, %v1246_v18 }
 0x227   :  { %964 = vmatpush1.xpose.msra.mxu0 %v881_v11  ;;  %v1248_v9 = vpop.eup %1247  ;;  %v701_v43 = vadd.f32 %v669_v32, %v1960_v54  ;;  %v734_v39 = vmul.f32 0.7978846, %v702_v0  ;;  %v735_v44 = vmul.f32 0.7978846, %v703_v60  ;;  %1263 = vtanh.f32 %v737_v8 }
 0x228   :  { %1097 = vmatprep.subr.msk.mxu0 %vm902_vm1, %v880_v40  ;;  %v1250_v6 = vpop.eup %1249  ;;  %v877_v31 = vmul.f32 %v845_v28, %v1758_v35  ;;  %v843_v62 = vmul.f32 0.5, %v811_v34  ;;  %v809_v38 = vadd.f32 1.0, %v1248_v9  ;;  %1265 = vtanh.f32 %v736_v17 }
 0x229   :  { %v876_v47 = vmul.f32 %v844_v46, %v1687_v29  ;;  %v842_v23 = vmul.f32 0.5, %v810_v49  ;;  %v808_v26 = vadd.f32 1.0, %v1250_v6  ;;  %v733_v55 = vmul.f32 0.7978846, %v701_v43 }
 0x22a   :  { %1267 = vtanh.f32 %v735_v44  ;;  %v875_v4 = vmul.f32 %v843_v62, %v1780_v24  ;;  %v841_v59 = vmul.f32 0.5, %v809_v38 }
 0x22b   :  { %966 = vmatpush1.xpose.msra.mxu0 %v879_v20  ;;  %v1252_v1 = vpop.eup %1251  ;;  %1269 = vtanh.f32 %v734_v39  ;;  %v874_v35 = vmul.f32 %v842_v23, %v1776_v58  ;;  %v840_v2 = vmul.f32 0.5, %v808_v26  ;;  %v1967_v39 = vld [vmem:[#allocation5_spill] sm:$0xff] }
 0x22c   :  { %1098 = vmatprep.subr.msk.mxu0 %vm902_vm1, %v878_v56  ;;  %v1254_v53 = vpop.eup %1253  ;;  %v807_v25 = vadd.f32 1.0, %v1252_v1  ;;  %1271 = vtanh.f32 %v733_v55  ;;  %v873_v29 = vmul.f32 %v841_v59, %v1796_v41  ;;  %v1026_v44 = vadd.s32 1, %v1967_v39 }
 0x22d   :  { %v806_v5 = vadd.f32 1.0, %v1254_v53  ;;  %v872_v24 = vmul.f32 %v840_v2, %v1792_v21 }
 0x22e   :  { %v1256_v51 = vpop.eup %1255  ;;  %v839_v63 = vmul.f32 0.5, %v807_v25 }
 0x22f   :  { %968 = vmatpush1.xpose.msra.mxu0 %v877_v31  ;;  %v1258_v33 = vpop.eup %1257  ;;  %v805_v45 = vadd.f32 1.0, %v1256_v51  ;;  %v838_v30 = vmul.f32 0.5, %v806_v5  ;;  %v898_v31 = vpop.permute.xlu0 %897 }
 0x230   :  { %1099 = vmatprep.subr.msk.mxu0 %vm902_vm1, %v876_v47  ;;  %v804_v11 = vadd.f32 1.0, %v1258_v33  ;;  %v871_v58 = vmul.f32 %v839_v63, %v1804_v27 }
 0x231   :  { %v837_v52 = vmul.f32 0.5, %v805_v45  ;;  %v870_v40 = vmul.f32 %v838_v30, %v1669_v36 }
 0x232   :  { %v1260_v16 = vpop.eup %1259  ;;  %v836_v22 = vmul.f32 0.5, %v804_v11 }
 0x233   :  { %970 = vmatpush1.xpose.msra.mxu0 %v875_v4  ;;  %v1262_v7 = vpop.eup %1261  ;;  %v803_v19 = vadd.f32 1.0, %v1260_v16  ;;  %v869_v21 = vmul.f32 %v837_v52, %v1666_v37 }
 0x234   :  { %1100 = vmatprep.subr.msk.mxu0 %vm902_vm1, %v874_v35  ;;  %v1264_v3 = vpop.eup %1263  ;;  %v802_v41 = vadd.f32 1.0, %v1262_v7  ;;  %v868_v60 = vmul.f32 %v836_v22, %v1622_v15 }
 0x235   :  { %v1266_v48 = vpop.eup %1265  ;;  %v835_v18 = vmul.f32 0.5, %v803_v19  ;;  %v801_v32 = vadd.f32 1.0, %v1264_v3 }
 0x236   :  { %v834_v17 = vmul.f32 0.5, %v802_v41  ;;  %v800_v27 = vadd.f32 1.0, %v1266_v48 }
 0x237   :  { %972 = vmatpush1.xpose.msra.mxu0 %v873_v29  ;;  %v1268_v0 = vpop.eup %1267  ;;  %v867_v36 = vmul.f32 %v835_v18, %v1619_v50  ;;  %v833_v57 = vmul.f32 0.5, %v801_v32 }
 0x238   :  { %1101 = vmatprep.subr.msk.mxu0 %vm902_vm1, %v872_v24  ;;  %v1270_v8 = vpop.eup %1269  ;;  %v799_v20 = vadd.f32 1.0, %v1268_v0  ;;  %v866_v34 = vmul.f32 %v834_v17, %v1616_v14  ;;  %v832_v9 = vmul.f32 0.5, %v800_v27 }
 0x239   :  { %v1272_v28 = vpop.eup %1271  ;;  %v798_v37 = vadd.f32 1.0, %v1270_v8  ;;  %v865_v15 = vmul.f32 %v833_v57, %v1613_v13  ;;  %v1966_v13 = vld [vmem:[#allocation15_spill] sm:$0xff] }
 0x23a   :  { %v831_v42 = vmul.f32 0.5, %v799_v20  ;;  %v797_v56 = vadd.f32 1.0, %v1272_v28  ;;  %v864_v46 = vmul.f32 %v832_v9, %v1610_v12  ;;  %v1108_v12 = vld [vmem:[%s1927_s1] ss:$0 sm:$0xff]  ;;  %s1277_s1 = scalar_lea.vmem %s1049_s2, 32 }
 0x23b   :  { %974 = vmatpush1.xpose.msra.mxu0 %v871_v58  ;;  %v830_v49 = vmul.f32 0.5, %v798_v37  ;;  %vm1031_vm2 = vcmp.eq.s32.totalorder %v1026_v44, %v1108_v12  ;;  %p1279_p2 = scmp.lt.s32.totalorder %s1277_s1, %s1273_s15 }
 0x23c   :  { %1102 = vmatprep.subr.msk.mxu0 %vm902_vm1, %v870_v40  ;;  %v863_v50 = vmul.f32 %v831_v42, %v1957_v61  ;;  %v829_v6 = vmul.f32 0.5, %v797_v56 }
 0x23d   :  { %v862_v14 = vmul.f32 %v830_v49, %v1604_v10  ;;  %p1280_p3 = por %p1279_p2, %p1278_p1 }
 0x23e   :  { %v861_v43 = vmul.f32 %v829_v6, %v1960_v54 }
 0x23f   :  { %976 = vmatpush1.xpose.msra.mxu0 %v869_v21  ;;  %p1281_p4 = pnand %p1280_p3, %p1274_p0 }
 0x240   :  { %1103 = vmatprep.subr.msk.mxu0 %vm902_vm1, %v868_v60 }
 0x243   :  { %978 = vmatpush1.xpose.msra.mxu0 %v867_v36 }
 0x244   :  { %1104 = vmatprep.subr.msk.mxu0 %vm902_vm1, %v866_v34 }
 0x247   :  { %980 = vmatpush1.xpose.msra.mxu0 %v865_v15 }
 0x248   :  { %1105 = vmatprep.subr.msk.mxu0 %vm902_vm1, %v864_v46 }
 0x24b   :  { %982 = vmatpush1.xpose.msra.mxu0 %v863_v50 }
 0x24c   :  { %1106 = vmatprep.subr.msk.mxu0 %vm902_vm1, %v862_v14 }
 0x24f   :  { %984 = vmatpush1.xpose.msra.mxu0 %v861_v43 }
 0x252   :  { %1018 = vmatmul.mubr.f32.vlgmr.msra.gmra.mxu0 %v1966_v13 }
 0x312   :  { %v1019_v62 = vpop.f32.mrf.mxu0 }
 0x313   :  { %v1020_v61 = vadd.f32 %v1019_v62, %v898_v31 }
 0x314   :  { %v1021_v10 = vpop.f32.mrf.mxu0 }
 0x315   :  { %v1032_v38 = vsel %vm1031_vm2, %v1020_v61, 0.0 }
 0x316   :  { %v1034_v1 = vsel %vm1033_vm3, %v1032_v38, 0.0 }
 0x317   :  { %v1035_v47 = vrot.slane %v1034_v1, 4 }
 0x319   :  { %v1036_v23 = vadd.f32 %v1035_v47, %v1034_v1 }
 0x31b   :  { %v1037_v54 = vrot.slane %v1036_v23, 2 }
 0x31d   :  { %v1038_v26 = vadd.f32 %v1037_v54, %v1036_v23 }
 0x31f   :  { %v1039_v53 = vrot.slane %v1038_v26, 1 }
 0x321   :  { %v1040_v55 = vadd.f32 %v1039_v53, %v1038_v26 }
 0x323   :  { %1041 = vst [vmem:[#allocation2] sm:$0x1] %v1040_v55 }
 0x324   :  { %1284 = shalt.err (!%p1281_p4)
}
 0x325   :  { %1051 = dma.vmem_to_hbm [thread:$0]  %s1049_s2, 16, %s1934_s8, [#allocation3]  }
 0x326   :  { %1293 = dma.done.wait [#allocation3], 16  }
 0x327   :  { %1294 = vsyncadd [#allocation3], 4294967280 }
 0x328   :  { %1055 = vsyncpa [#allocation3], 1 }

</bundles_post_ra>
